<compile_context>
chip_gen: v6e
topology: v6e:2x2x1
jax: 0.10.0
libtpu: 0.0.40
codegen_flags: <defaults>
</compile_context>

<pallas_src>
import functools

import jax
import jax.numpy as jnp
from jax.experimental import pallas as pl
from jax.experimental.pallas import tpu as pltpu


def _round_up(v, m):
    return ((v + m - 1) // m) * m


def _diff_cluster_kernel(stiff_ref, x_ref, ct_ref, csq_ref, bias_ref,
                         assign_ref, *, k_valid):
    # stiff_ref: (1,)        f32 SMEM  runtime stiffness scalar
    # x_ref:     (TN, D)     VMEM      row tile of x
    # ct_ref:    (D, K_pad)  VMEM      -2 * centroids^T, zero-padded (resident)
    # csq_ref:   (1, K_pad)  VMEM      ||c||^2 per centroid, 0 on padding (resident)
    # bias_ref:  (1, K_pad)  VMEM      0 on valid columns, -1e30 on padding (resident)
    # assign_ref:(TN, K)     VMEM      softmax assignments (unpadded K)
    x = x_ref[...].astype(jnp.float32)                                   # (TN, D)

    # cdist via ||x||^2 + ||c||^2 - 2 x.c (MXU path); clamp >= 0 before sqrt.
    x_sq = jnp.sum(x * x, axis=1, keepdims=True)                         # (TN, 1)
    xc_m2 = jnp.dot(x, ct_ref[...], preferred_element_type=jnp.float32)  # (TN, K_pad) = -2 x.c
    sq_dists = jnp.maximum(x_sq + csq_ref[...] + xc_m2, 0.0)
    dists = jnp.sqrt(sq_dists)                                           # (TN, K_pad)

    # softmax(-stiffness * dists) along the cluster axis; padded cols get -1e30.
    logits = (-stiff_ref[0]) * dists + bias_ref[...]
    m = jnp.max(logits, axis=1, keepdims=True)
    e = jnp.exp(logits - m)
    denom = jnp.sum(e, axis=1, keepdims=True)
    probs = e / denom                     # exact normalization (rows sum to 1)
    assign_ref[...] = probs[:, :k_valid].astype(assign_ref.dtype)


def diff_clusterer_forward(x, centroids, stiffness, return_centers=True,
                           tile_n=1024):
    """x: (N, D) float, centroids: (K, D) float, stiffness: python/0-d scalar."""
    n, d = x.shape
    k, d2 = centroids.shape
    assert d == d2, "feature dim of x must equal centroid dim (= num_clusters)"

    # Lane-dense cluster axis for the in-register compute only.
    k_pad = _round_up(k, 128)

    # TODO(synk): for very large K (resident -2*c^T block D*K_pad*4 bytes over
    # ~24 MiB on v7x) switch to a K-tile grid axis with an online softmax
    # instead of fully-resident centroids. Not needed at the module's K=D sizes.

    # Row tile: multiple of 8; at most ~N/2 when N is moderate so the grid has
    # >= 2 steps for v7x's two TensorCores; capped at tile_n for big N.
    if n <= 8:
        tn = n                       # block dim == full array dim (legal)
    else:
        tn = _round_up(min(tile_n, pl.cdiv(n, 2)), 8)
    grid = (pl.cdiv(n, tn),)

    c32 = centroids.astype(jnp.float32)
    x32 = x.astype(jnp.float32)
    ct_m2 = jnp.pad(-2.0 * c32.T, ((0, 0), (0, k_pad - k)))              # (D, K_pad)
    c_sq = jnp.pad(jnp.sum(c32 * c32, axis=1)[None, :],
                   ((0, 0), (0, k_pad - k)))                             # (1, K_pad)
    col_bias = jnp.pad(jnp.zeros((1, k), jnp.float32),
                       ((0, 0), (0, k_pad - k)),
                       constant_values=jnp.float32(-1e30))               # (1, K_pad)
    stiff_arr = jnp.asarray([stiffness], dtype=jnp.float32)

    kernel = functools.partial(_diff_cluster_kernel, k_valid=k)

    assignments = pl.pallas_call(
        kernel,
        out_shape=jax.ShapeDtypeStruct((n, k), jnp.float32),
        grid=grid,
        in_specs=[
            pl.BlockSpec(memory_space=pltpu.MemorySpace.SMEM),           # stiffness
            pl.BlockSpec((tn, d), lambda i: (i, 0)),                     # x row tile
            pl.BlockSpec((d, k_pad), lambda i: (0, 0)),                  # -2*c^T (resident)
            pl.BlockSpec((1, k_pad), lambda i: (0, 0)),                  # ||c||^2 (resident)
            pl.BlockSpec((1, k_pad), lambda i: (0, 0)),                  # pad-col bias (resident)
        ],
        out_specs=pl.BlockSpec((tn, k), lambda i: (i, 0)),               # unpadded K out
        compiler_params=pltpu.CompilerParams(
            dimension_semantics=("parallel",),
            vmem_limit_bytes=32 * 1024 * 1024,
        ),
        cost_estimate=pl.CostEstimate(
            flops=int(2 * n * k_pad * d + 8 * n * k_pad),
            transcendentals=int(2 * n * k_pad),
            bytes_accessed=int(4 * (n * d + d * k_pad + 2 * k_pad + n * k)),
        ),
    )(stiff_arr, x32, ct_m2, c_sq, col_bias)

    if return_centers:
        return assignments, centroids
    return assignments


def init_centroids(key, num_clusters):
    # torch.nn.init.xavier_normal_ on (K, K): std = sqrt(2 / (K + K)) = sqrt(1/K)
    std = (1.0 / num_clusters) ** 0.5
    return std * jax.random.normal(key, (num_clusters, num_clusters),
                                   dtype=jnp.float32)


def _reference(x, centroids, stiffness):
    diff = x[:, None, :] - centroids[None, :, :]
    dists = jnp.sqrt(jnp.maximum(jnp.sum(diff * diff, axis=-1), 0.0))
    return jax.nn.softmax(-stiffness * dists, axis=1)


if __name__ == "__main__":
    num_clusters = 8     # K == D (torch module: centroids are (K, K))
    batch = 16
    init_stiffness = 1.0
    # TODO(synk): stiffness_inc is a host-side Python-state update in the torch
    # module; it does not affect a single forward call, so it stays outside.

    key = jax.random.PRNGKey(0)
    kx, kc = jax.random.split(key)
    x = jax.random.normal(kx, (batch, num_clusters), dtype=jnp.float32)
    centroids = init_centroids(kc, num_clusters)

    assignments, centers = diff_clusterer_forward(x, centroids, init_stiffness)
    jax.block_until_ready(assignments)
    jax.block_until_ready(centers)

    assert assignments.shape == (batch, num_clusters)
    # softmax rows sum to 1 (exact normalization now)
    row_sums = jnp.sum(assignments, axis=1)
    assert bool(jnp.allclose(row_sums, 1.0, atol=1e-5)), row_sums
    # match pure-JAX reference of the torch forward
    ref = _reference(x, centroids, init_stiffness)
    assert bool(jnp.allclose(assignments, ref, atol=1e-4)), float(
        jnp.max(jnp.abs(assignments - ref)))

    print("KERNEL_OK")
</pallas_src>

<mosaic_0001>
module attributes {stable_mosaic.version = 11 : i64} {
  func.func @_diff_cluster_kernel(%arg0: i32, %arg1: memref<1xf32, #tpu.memory_space<smem>>, %arg2: memref<8x8xf32, #tpu.memory_space<vmem>>, %arg3: memref<8x128xf32, #tpu.memory_space<vmem>>, %arg4: memref<1x128xf32, #tpu.memory_space<vmem>>, %arg5: memref<1x128xf32, #tpu.memory_space<vmem>>, %arg6: memref<8x8xf32, #tpu.memory_space<vmem>>) attributes {dimension_semantics = [#tpu.dimension_semantics<parallel>], iteration_bounds = array<i64: 2>, scalar_prefetch = 0 : i64, scratch_operands = 0 : i64, tpu.core_type = #tpu.core_type<tc>, window_params = [{transform_indices = @transform_0, window_bounds = array<i64: 1>}, {transform_indices = @transform_1, window_bounds = array<i64: 8, 8>}, {pipeline_mode = #tpu.pipeline_mode<synchronous>, transform_indices = @transform_2, window_bounds = array<i64: 8, 128>}, {pipeline_mode = #tpu.pipeline_mode<synchronous>, transform_indices = @transform_3, window_bounds = array<i64: 1, 128>}, {pipeline_mode = #tpu.pipeline_mode<synchronous>, transform_indices = @transform_4, window_bounds = array<i64: 1, 128>}, {transform_indices = @transform_5, window_bounds = array<i64: 8, 8>}]} {
    %c0 = arith.constant 0 : index
    %c0_0 = arith.constant 0 : index
    %0 = vector.load %arg2[%c0, %c0_0] : memref<8x8xf32, #tpu.memory_space<vmem>>, vector<8x8xf32>
    %1 = arith.mulf %0, %0 : vector<8x8xf32>
    %cst = arith.constant dense<0.000000e+00> : vector<8xf32>
    %2 = vector.multi_reduction <add>, %1, %cst [1] : vector<8x8xf32> to vector<8xf32>
    %3 = vector.shape_cast %2 : vector<8xf32> to vector<8x1xf32>
    %c0_1 = arith.constant 0 : index
    %c0_2 = arith.constant 0 : index
    %4 = vector.load %arg3[%c0_1, %c0_2] : memref<8x128xf32, #tpu.memory_space<vmem>>, vector<8x128xf32>
    %cst_3 = arith.constant dense<0.000000e+00> : vector<8x128xf32>
    %5 = tpu.matmul %0, %4, %cst_3 {dimension_numbers = #tpu.dot_dimension_numbers<[1], [0], [0], [1], [0, 0, 1, 1], [], []>} : vector<8x8xf32>, vector<8x128xf32>, vector<8x128xf32> -> vector<8x128xf32>
    %c0_4 = arith.constant 0 : index
    %c0_5 = arith.constant 0 : index
    %6 = vector.load %arg4[%c0_4, %c0_5] : memref<1x128xf32, #tpu.memory_space<vmem>>, vector<1x128xf32>
    %7 = vector.broadcast %3 : vector<8x1xf32> to vector<8x128xf32>
    %8 = vector.broadcast %6 : vector<1x128xf32> to vector<8x128xf32>
    %9 = arith.addf %7, %8 : vector<8x128xf32>
    %10 = arith.addf %9, %5 : vector<8x128xf32>
    %cst_6 = arith.constant 0.000000e+00 : f32
    %11 = vector.broadcast %cst_6 : f32 to vector<8x128xf32>
    %12 = arith.maximumf %10, %11 : vector<8x128xf32>
    %13 = math.sqrt %12 : vector<8x128xf32>
    %c0_7 = arith.constant 0 : index
    %14 = memref.load %arg1[%c0_7] : memref<1xf32, #tpu.memory_space<smem>>
    %cst_8 = arith.constant 0.000000e+00 : f32
    %15 = arith.subf %cst_8, %14 : f32
    %16 = vector.broadcast %15 : f32 to vector<8x128xf32>
    %17 = arith.mulf %16, %13 : vector<8x128xf32>
    %c0_9 = arith.constant 0 : index
    %c0_10 = arith.constant 0 : index
    %18 = vector.load %arg5[%c0_9, %c0_10] : memref<1x128xf32, #tpu.memory_space<vmem>>, vector<1x128xf32>
    %19 = vector.broadcast %18 : vector<1x128xf32> to vector<8x128xf32>
    %20 = arith.addf %17, %19 : vector<8x128xf32>
    %cst_11 = arith.constant dense<0xFF800000> : vector<8xf32>
    %21 = vector.multi_reduction <maximumf>, %20, %cst_11 [1] : vector<8x128xf32> to vector<8xf32>
    %22 = vector.shape_cast %21 : vector<8xf32> to vector<8x1xf32>
    %23 = vector.broadcast %22 : vector<8x1xf32> to vector<8x128xf32>
    %24 = arith.subf %20, %23 : vector<8x128xf32>
    %25 = math.exp %24 : vector<8x128xf32>
    %cst_12 = arith.constant dense<0.000000e+00> : vector<8xf32>
    %26 = vector.multi_reduction <add>, %25, %cst_12 [1] : vector<8x128xf32> to vector<8xf32>
    %27 = vector.shape_cast %26 : vector<8xf32> to vector<8x1xf32>
    %28 = vector.broadcast %27 : vector<8x1xf32> to vector<8x128xf32>
    %29 = arith.divf %25, %28 : vector<8x128xf32>
    %30 = vector.extract_strided_slice %29 {offsets = [0, 0], sizes = [8, 8], strides = [1, 1]} : vector<8x128xf32> to vector<8x8xf32>
    %c0_13 = arith.constant 0 : index
    %c0_14 = arith.constant 0 : index
    %31 = vector.load %arg6[%c0_13, %c0_14] : memref<8x8xf32, #tpu.memory_space<vmem>>, vector<8x8xf32>
    tpu.vector_store %arg6[%c0_13, %c0_14], %30 {strides = array<i32>} : memref<8x8xf32, #tpu.memory_space<vmem>>, vector<8x8xf32>,
    return
  }
  func.func @transform_0(%arg0: i32) -> i32 {
    %c0_i32 = arith.constant 0 : i32
    %c0_i32_0 = arith.constant 0 : i32
    return %c0_i32 : i32
  }
  func.func @transform_1(%arg0: i32) -> (i32, i32) {
    %c0_i32 = arith.constant 0 : i32
    %c0_i32_0 = arith.constant 0 : i32
    return %arg0, %c0_i32 : i32, i32
  }
  func.func @transform_2(%arg0: i32) -> (i32, i32) {
    %c0_i32 = arith.constant 0 : i32
    %c0_i32_0 = arith.constant 0 : i32
    %c0_i32_1 = arith.constant 0 : i32
    return %c0_i32, %c0_i32_0 : i32, i32
  }
  func.func @transform_3(%arg0: i32) -> (i32, i32) {
    %c0_i32 = arith.constant 0 : i32
    %c0_i32_0 = arith.constant 0 : i32
    %c0_i32_1 = arith.constant 0 : i32
    return %c0_i32, %c0_i32_0 : i32, i32
  }
  func.func @transform_4(%arg0: i32) -> (i32, i32) {
    %c0_i32 = arith.constant 0 : i32
    %c0_i32_0 = arith.constant 0 : i32
    %c0_i32_1 = arith.constant 0 : i32
    return %c0_i32, %c0_i32_0 : i32, i32
  }
  func.func @transform_5(%arg0: i32) -> (i32, i32) {
    %c0_i32 = arith.constant 0 : i32
    %c0_i32_0 = arith.constant 0 : i32
    return %arg0, %c0_i32 : i32, i32
  }
}

</mosaic_0001>

<bundles_post_ra>
// kernel: tpu_custom_call.1
= control target key start
LH: loop header
LB: loop body
LE: loop exit
PB: predicated region body
PF: predicated region fallthrough
CT: control target
= control target key end

     0   :  { %s471_s20 = smov 0   ;;  %s507_s0 = inlined_call_operand.<no memory space> [shape: f32[1], index: 0, kind: input, shape index: {}]   ;;  %s508_s1 = inlined_call_operand.vmem [shape: f32[16,8], index: 1, kind: input, shape index: {}]   ;;  %s509_s2 = inlined_call_operand.vmem [shape: f32[8,128], index: 2, kind: input, shape index: {}]   ;;  %s510_s3 = inlined_call_operand.vmem [shape: f32[1,128], index: 3, kind: input, shape index: {}]   ;;  %s511_s4 = inlined_call_operand.vmem [shape: f32[1,128], index: 4, kind: input, shape index: {}]   ;;  %s512_s5 = inlined_call_operand.vmem [shape: f32[16,8], index: 5, kind: output, shape index: {}]  }
   0x1   :  { %10 = sst [smem:[#allocation2]] %s507_s0 }
   0x2 LB: > { %s393_s21 = sadd.s32 4294967295, %s434_s20   ;;  %p397_p0 = scmp.ge.s32.totalorder %s434_s20, 1  ;;  %s434_s20 = sphi %s471_s20, %s16_s20  }
   0x3   : > { %p187_p1 = scmp.lt.s32.totalorder %s434_s20, 3 }
   0x5   : > { %p188_p2 = pnand %p397_p0, %p187_p1 }
   0x6   : > { %p213_p3 = scmp.lt.s32.totalorder (!%p188_p2), %s393_s21, 1  ;;  %s318_s29 = sld [smem:[#allocation2]] (!%p188_p2) }
   0x7   : > { %191 = sbr.rel (%p188_p2) target bundleno = 546 (0x222), region = 40 }
   0xc   : > { %v227_v0 = vld [vmem:[%s509_s2] sm:$0xff]  ;;  %v436_v1 = vmov 0.0   ;;  %vm437_vm0 = vmmov 0   ;;  %s514_s21 = smov (!%p213_p3, %s393_s21), 1  ;;  %vm223_vm1 = vcmask 64512   ;;  %s319_s30 = ssub.f32 0.0, %s318_s29 }
   0xd   : > { %407 = vmatprep.subr.mxu0 %v436_v1  ;;  %409 = vmatprep.mubr.msk.f32.mxu0 %vm437_vm0, %v436_v1  ;;  %s398_s0 = sshll.u32 %s514_s21, 3  ;;  %v401_v5 = vld [vmem:[%s510_s3] ss:$0 sm:$0xff] }
   0xe   : > { %408 = vmatpush3.msra.mxu0 %v227_v0  ;;  %s216_s26 = scalar_lea.vmem %s508_s1, %s398_s0  ;;  %v320_v15 = vstv %s319_s30  ;;  %v402_v18 = vld [vmem:[%s511_s4] ss:$0 sm:$0xff]  ;;  %s220_s10 = scalar_lea.vmem %s512_s5, %s398_s0 }
   0xf   : > { %v221_v2 = vld [vmem:[%s216_s26] sm:$0xff] }
  0x10   : > { %410 = vmatmul.mubr.msk.f32.vlgmr.msra.gmra.mxu0 %vm223_vm1, %v221_v2  ;;  %v222_v3 = vmul.f32 %v221_v2, %v221_v2 }
  0x12   : > { %v224_v4 = vsel %vm223_vm1, %v222_v3, 0.0 }
  0x13   : > { %225 = vadd.xlane.f32.xlu0 %v224_v4 }
  0x9c   : > { %v226_v6 = vpop.xlane.xlu0 %225 }
  0x9d   : > { %v308_v7 = vadd.f32 %v401_v5, %v226_v6 }
  0xd0   : > { %v297_v8 = vpop.f32.mrf.mxu0 }
  0xd1   : > { %v309_v9 = vadd.f32 %v308_v7, %v297_v8 }
  0xd2   : > { %v411_v10 = vpop.f32.mrf.mxu0 }
  0xd3   : > { %v310_v11 = vmax.f32 %v309_v9, 0.0 }
  0xd5   : > { %422 = vrsqrt.f32 %v310_v11  ;;  %vm313_vm2 = vcmp.eq.f32.partialorder %v310_v11, inf  ;;  %v316_v14 = vand.u32 2147483648, %v310_v11  ;;  %vm315_vm3 = vcmp.eq.f32.partialorder %v310_v11, 0.0 }
  0xe2   : > { %v423_v12 = vpop.eup %422 }
  0xe3   : > { %v312_v13 = vmul.f32 %v423_v12, %v310_v11 }
  0xe5   : > { %v314_v16 = vsel %vm313_vm2, %v310_v11, %v312_v13 }
  0xe6   : > { %v317_v17 = vsel %vm315_vm3, %v316_v14, %v314_v16 }
  0xe7   : > { %v321_v19 = vmul.f32 %v320_v15, %v317_v17 }
  0xe9   : > { %v329_v20 = vadd.f32 %v402_v18, %v321_v19 }
  0xeb   : > { %330 = vmax.xlane.f32.xlu0 %v329_v20 }
 0x174   : > { %v331_v21 = vpop.xlane.xlu0 %330 }
 0x175   : > { %v332_v22 = vsub.f32 %v329_v20, %v331_v21 }
 0x177   : > { %v333_v23 = vmul.f32 1.442695, %v332_v22 }
 0x179   : > { %424 = vpow2.f32 %v333_v23 }
 0x186   : > { %v425_v24 = vpop.eup %424 }
 0x187   : > { %335 = vadd.xlane.f32.xlu1 %v425_v24 }
 0x210   : > { %v336_v25 = vpop.xlane.xlu1 %335 }
 0x211   : > { %426 = vrcp.f32 %v336_v25 }
 0x21e   : > { %v427_v26 = vpop.eup %426 }
 0x21f   : > { %v338_v27 = vmul.f32 %v427_v26, %v425_v24 }
 0x221   : > { %339 = vst.msk [vmem:[%s220_s10] sm:$0xff] %vm223_vm1, %v338_v27 }
 0x222 PF: > { %s16_s20 = sadd.s32 1, %s434_s20  }
 0x223   : > { %p13_p4 = scmp.ge.s32.totalorder %s16_s20, 4  }
 0x225   :  { %15 = sbr.rel (!%p13_p4) target bundleno = 2 (0x2), region = 70 }

</bundles_post_ra>
